<compile_context>
chip_gen: v7x
topology: tpu7x:2x2x1
jax: 0.10.0
libtpu: 0.0.40
codegen_flags: <defaults>
</compile_context>

<pallas_src>
import functools

import numpy as np

import jax
import jax.numpy as jnp
from jax.experimental import pallas as pl
from jax.experimental.pallas import tpu as pltpu


def _rope_kernel(*refs, static_scale, dynamic_scale):
    # dynamic_scale: (scale_ref, inv_ref, pos_ref, cos_ref, sin_ref)
    # static path  : (inv_ref, pos_ref, cos_ref, sin_ref)
    if dynamic_scale:
        scale_ref, inv_ref, pos_ref, cos_ref, sin_ref = refs
    else:
        inv_ref, pos_ref, cos_ref, sin_ref = refs

    pos = pos_ref[...]                      # (ts, 1)   f32
    inv = inv_ref[...]                      # (1, half) f32
    freqs = pos * inv                       # (ts, half) f32 — VPU outer product

    c = jnp.cos(freqs)                      # half-width transcendentals (EUP)
    s = jnp.sin(freqs)
    if dynamic_scale:
        scale = scale_ref[0]                # SMEM scalar
        c = c * scale
        s = s * scale
    elif static_scale != 1.0:               # static Python guard: free when 1.0
        c = c * static_scale
        s = s * static_scale
    c = c.astype(cos_ref.dtype)             # downcast before duplication
    s = s.astype(sin_ref.dtype)

    # Duplicate the half-width result into both halves of the output row.
    cos_ref[...] = jnp.concatenate([c, c], axis=-1)
    sin_ref[...] = jnp.concatenate([s, s], axis=-1)


def _choose_tile_rows(n_rows, dim, out_bytes, rows_per_block, vmem_budget_bytes):
    """Pick the row-tile size under an explicit double-buffered VMEM budget."""
    packing = max(1, 4 // out_bytes)
    sublane = 8 * packing                   # native sublane tile: 8/16/32 rows
    # Per-row, double-buffered VMEM:
    #   2 outputs x 2 buffers x dim*out_bytes
    # + 2 buffers x 512 B for the lane-padded (ts, 1) f32 positions block.
    bytes_per_row = 4 * dim * out_bytes + 2 * 512
    ts_cap = max(sublane, (vmem_budget_bytes // bytes_per_row) // sublane * sublane)
    ts = max(sublane, min(int(rows_per_block), ts_cap) // sublane * sublane)
    if n_rows <= ts:
        return n_rows                       # single full-extent block (always layout-legal)
    return ts


def llama_rotary_embedding(x, position_ids, inv_freq, attention_scaling=1.0,
                           *, rows_per_block=4096,
                           vmem_budget_bytes=16 * 1024 * 1024):
    """Pallas equivalent of LlamaRotaryEmbedding.forward (rope_type='default').

    x            : only its dtype is used (as in the PyTorch module).
    position_ids : (B, S) integer positions.
    inv_freq     : (half,) float32.
    attention_scaling : Python float (static path) or traced/device scalar.
    Returns (cos, sin), each (B, S, 2*half) with dtype x.dtype.

    Note: positions are converted to f32 (matching HF `.float()`), so integer
    positions above 2**24 lose exactness — same as the reference.
    """
    B, S = position_ids.shape
    half = int(inv_freq.shape[0])
    dim = 2 * half
    out_dtype = x.dtype
    out_bytes = jnp.dtype(out_dtype).itemsize

    # --- static vs dynamic attention_scaling -------------------------------
    static_scale = None
    if isinstance(attention_scaling, (int, float, np.floating, np.integer)):
        static_scale = float(attention_scaling)
    dynamic_scale = static_scale is None

    # --- batch dedup (only when positions are concrete & identical rows) ---
    dedup = False
    if B > 1:
        try:
            pid_np = np.asarray(position_ids)      # raises if traced under jit
            dedup = bool((pid_np == pid_np[:1]).all())
        except Exception:
            dedup = False
    pid = position_ids[:1] if dedup else position_ids
    nb = pid.shape[0]
    n_rows = nb * S

    # --- tiling --------------------------------------------------------------
    ts = _choose_tile_rows(n_rows, dim, out_bytes, rows_per_block, vmem_budget_bytes)
    n_blocks = pl.cdiv(n_rows, ts)

    pos_2d = pid.reshape(-1, 1).astype(jnp.float32)      # (n_rows, 1) f32
    inv_f = inv_freq.astype(jnp.float32).reshape(1, half)  # (1, half)  f32

    in_specs = [
        pl.BlockSpec((1, half), lambda i: (0, 0)),        # inv_freq (shared)
        pl.BlockSpec((ts, 1), lambda i: (i, 0)),          # positions tile
    ]
    args = [inv_f, pos_2d]
    if dynamic_scale:
        scale_arr = jnp.asarray(attention_scaling, jnp.float32).reshape(1)
        in_specs = [pl.BlockSpec(memory_space=pltpu.MemorySpace.SMEM)] + in_specs
        args = [scale_arr] + args

    kernel = functools.partial(
        _rope_kernel,
        static_scale=1.0 if dynamic_scale else static_scale,
        dynamic_scale=dynamic_scale,
    )

    cost = pl.CostEstimate(
        flops=int(2 * n_rows * half),                       # pos*inv (+ scaling)
        transcendentals=int(2 * n_rows * half),             # cos + sin, half-width
        bytes_accessed=int(n_rows * 4 + half * 4            # inputs (f32)
                           + 2 * n_rows * dim * out_bytes), # cos + sin outputs
    )

    cos_f, sin_f = pl.pallas_call(
        kernel,
        out_shape=(
            jax.ShapeDtypeStruct((n_rows, dim), out_dtype),
            jax.ShapeDtypeStruct((n_rows, dim), out_dtype),
        ),
        grid_spec=pltpu.PrefetchScalarGridSpec(
            num_scalar_prefetch=0,
            grid=(n_blocks,),
            in_specs=in_specs,
            out_specs=[
                pl.BlockSpec((ts, dim), lambda i: (i, 0)),
                pl.BlockSpec((ts, dim), lambda i: (i, 0)),
            ],
        ),
        compiler_params=pltpu.CompilerParams(
            dimension_semantics=("parallel",),
            vmem_limit_bytes=32 * 1024 * 1024,
        ),
        cost_estimate=cost,
    )(*args)

    cos = cos_f.reshape(nb, S, dim)                 # free contiguous reshape
    sin = sin_f.reshape(nb, S, dim)
    if dedup:
        cos = jnp.broadcast_to(cos, (B, S, dim))
        sin = jnp.broadcast_to(sin, (B, S, dim))
    return cos, sin


def _reference(x, position_ids, inv_freq, attention_scaling=1.0):
    # Pure-JAX reference mirroring the PyTorch forward.
    pos = position_ids.astype(jnp.float32)                     # (B, S)
    freqs = pos[:, :, None] * jnp.asarray(inv_freq, jnp.float32)[None, None, :]
    emb = jnp.concatenate([freqs, freqs], axis=-1)             # (B, S, dim)
    scale = jnp.asarray(attention_scaling, jnp.float32)
    cos = (jnp.cos(emb) * scale).astype(x.dtype)
    sin = (jnp.sin(emb) * scale).astype(x.dtype)
    return cos, sin


def _check(B, S, head_dim, attention_scaling, out_dtype, key,
           shared_positions=False, rows_per_block=4096):
    base = 10000.0
    inv_freq = 1.0 / (
        base ** (jnp.arange(0, head_dim, 2, dtype=jnp.float32) / head_dim)
    )
    kx, kp = jax.random.split(key)
    x = jax.random.normal(kx, (B, S, head_dim), dtype=jnp.float32).astype(out_dtype)
    if shared_positions:
        position_ids = jnp.broadcast_to(
            jnp.arange(S, dtype=jnp.int32)[None, :], (B, S))
    else:
        offs = jax.random.randint(kp, (B, 1), 0, 7)
        position_ids = jnp.arange(S, dtype=jnp.int32)[None, :] + offs

    cos, sin = llama_rotary_embedding(
        x, position_ids, inv_freq, attention_scaling,
        rows_per_block=rows_per_block)
    cos, sin = jax.block_until_ready((cos, sin))

    cos_ref, sin_ref = _reference(x, position_ids, inv_freq, attention_scaling)
    assert cos.shape == (B, S, head_dim) and sin.shape == (B, S, head_dim)
    assert cos.dtype == out_dtype and sin.dtype == out_dtype
    assert jnp.allclose(cos.astype(jnp.float32), cos_ref.astype(jnp.float32),
                        atol=1e-2, rtol=1e-2)
    assert jnp.allclose(sin.astype(jnp.float32), sin_ref.astype(jnp.float32),
                        atol=1e-2, rtol=1e-2)


if __name__ == "__main__":
    key = jax.random.PRNGKey(0)
    k1, k2, k3, k4 = jax.random.split(key, 4)

    # Small decode-style case: bf16 output, head_dim=64, per-batch offsets.
    _check(B=2, S=8, head_dim=64, attention_scaling=1.0,
           out_dtype=jnp.bfloat16, key=k1)

    # Lane-dense head_dim=128 (standard Llama), f32, static non-unit scaling.
    _check(B=1, S=128, head_dim=128, attention_scaling=0.75,
           out_dtype=jnp.float32, key=k2)

    # Shared positions across batch (dedup path) + device-scalar scaling
    # (exercises the dynamic SMEM-scale kernel path).
    _check(B=3, S=64, head_dim=128,
           attention_scaling=jnp.asarray(0.5, jnp.float32),
           out_dtype=jnp.bfloat16, key=k3, shared_positions=True)

    # Ragged grid: N not a multiple of the row tile (pl.cdiv masking path,
    # no wrapper-side pad/slice).
    _check(B=1, S=200, head_dim=128, attention_scaling=1.0,
           out_dtype=jnp.float32, key=k4, rows_per_block=64)

    print("KERNEL_OK")
</pallas_src>

<mosaic_0001>
module attributes {stable_mosaic.version = 11 : i64} {
  func.func @_rope_kernel(%arg0: i32, %arg1: memref<1x32xf32, #tpu.memory_space<vmem>>, %arg2: memref<16x1xf32, #tpu.memory_space<vmem>>, %arg3: memref<16x64xbf16, #tpu.memory_space<vmem>>, %arg4: memref<16x64xbf16, #tpu.memory_space<vmem>>) attributes {dimension_semantics = [#tpu.dimension_semantics<parallel>], iteration_bounds = array<i64: 1>, scalar_prefetch = 0 : i64, scratch_operands = 0 : i64, tpu.core_type = #tpu.core_type<tc>, window_params = [{pipeline_mode = #tpu.pipeline_mode<synchronous>, transform_indices = @transform_0, window_bounds = array<i64: 1, 32>}, {transform_indices = @transform_1, window_bounds = array<i64: 16, 1>}, {transform_indices = @transform_2, window_bounds = array<i64: 16, 64>}, {transform_indices = @transform_3, window_bounds = array<i64: 16, 64>}]} {
    %c0 = arith.constant 0 : index
    %c0_0 = arith.constant 0 : index
    %0 = vector.load %arg2[%c0, %c0_0] : memref<16x1xf32, #tpu.memory_space<vmem>>, vector<16x1xf32>
    %c0_1 = arith.constant 0 : index
    %c0_2 = arith.constant 0 : index
    %1 = vector.load %arg1[%c0_1, %c0_2] : memref<1x32xf32, #tpu.memory_space<vmem>>, vector<1x32xf32>
    %2 = vector.broadcast %0 : vector<16x1xf32> to vector<16x32xf32>
    %3 = vector.broadcast %1 : vector<1x32xf32> to vector<16x32xf32>
    %4 = arith.mulf %2, %3 : vector<16x32xf32>
    %5 = math.cos %4 : vector<16x32xf32>
    %6 = math.sin %4 : vector<16x32xf32>
    %7 = arith.truncf %5 : vector<16x32xf32> to vector<16x32xbf16>
    %8 = arith.truncf %6 : vector<16x32xf32> to vector<16x32xbf16>
    %9 = tpu.concatenate %7, %7 in 1 : vector<16x32xbf16>, vector<16x32xbf16> -> vector<16x64xbf16>
    %c0_3 = arith.constant 0 : index
    %c0_4 = arith.constant 0 : index
    %10 = vector.load %arg3[%c0_3, %c0_4] : memref<16x64xbf16, #tpu.memory_space<vmem>>, vector<16x64xbf16>
    tpu.vector_store %arg3[%c0_3, %c0_4], %9 {strides = array<i32>} : memref<16x64xbf16, #tpu.memory_space<vmem>>, vector<16x64xbf16>,
    %11 = tpu.concatenate %8, %8 in 1 : vector<16x32xbf16>, vector<16x32xbf16> -> vector<16x64xbf16>
    %c0_5 = arith.constant 0 : index
    %c0_6 = arith.constant 0 : index
    %12 = vector.load %arg4[%c0_5, %c0_6] : memref<16x64xbf16, #tpu.memory_space<vmem>>, vector<16x64xbf16>
    tpu.vector_store %arg4[%c0_5, %c0_6], %11 {strides = array<i32>} : memref<16x64xbf16, #tpu.memory_space<vmem>>, vector<16x64xbf16>,
    return
  }
  func.func @transform_0(%arg0: i32) -> (i32, i32) {
    %c0_i32 = arith.constant 0 : i32
    %c0_i32_0 = arith.constant 0 : i32
    %c0_i32_1 = arith.constant 0 : i32
    return %c0_i32, %c0_i32_0 : i32, i32
  }
  func.func @transform_1(%arg0: i32) -> (i32, i32) {
    %c0_i32 = arith.constant 0 : i32
    %c0_i32_0 = arith.constant 0 : i32
    return %arg0, %c0_i32 : i32, i32
  }
  func.func @transform_2(%arg0: i32) -> (i32, i32) {
    %c0_i32 = arith.constant 0 : i32
    %c0_i32_0 = arith.constant 0 : i32
    return %arg0, %c0_i32 : i32, i32
  }
  func.func @transform_3(%arg0: i32) -> (i32, i32) {
    %c0_i32 = arith.constant 0 : i32
    %c0_i32_0 = arith.constant 0 : i32
    return %arg0, %c0_i32 : i32, i32
  }
}

</mosaic_0001>

<bundles_post_ra>
// kernel: tpu_custom_call.1
= control target key start
LH: loop header
LB: loop body
LE: loop exit
PB: predicated region body
PF: predicated region fallthrough
CT: control target
= control target key end

     0   :  { %9 = vsyncpa [#allocation3], 0  ;;  %v614_v1 = vmov 0   ;;  %s761_s0 = inlined_call_operand.vmem [shape: f32[1,32], index: 0, kind: input, shape index: {}]   ;;  %s762_s1 = inlined_call_operand.vmem [shape: f32[16,1], index: 1, kind: input, shape index: {}]   ;;  %s763_s2 = inlined_call_operand.hbm [shape: bf16[16,64], index: 2, kind: output, shape index: {0}]   ;;  %s764_s3 = inlined_call_operand.hbm [shape: bf16[16,64], index: 3, kind: output, shape index: {1}]  }
   0x1   :  { %v15_v0 = vld [vmem:[%s762_s1] sm:$0xff]  ;;  %557 = vset.pattern.permute.xlu0 %v614_v1  ;;  %v16_v2 = vld [vmem:[%s762_s1 + $0x8] sm:$0xff] }
   0x2   :  { %20 = vperm.xlu0 %557, %v15_v0  }
   0x3   :  { %10 = vsyncpa [#allocation5], 0  ;;  %v516_v3 = vld [vmem:[%s761_s0] ss:$0 sm:$0xff]  ;;  %v615_v24 = vmov 683565275  }
   0x4   :  { %v616_v28 = vmov 2475754826   ;;  %v617_v30 = vmov 2131351028   ;;  %v618_v32 = vmov 2102212464  }
   0x5   :  { %v619_v34 = vmov 920167782   ;;  %v620_v41 = vmov 1326507024   ;;  %s621_s0 = smov 32   ;;  %s622_s1 = smov [#allocation2]  }
   0x6   :  { %25 = vperm.xlu0 %557, %v16_v2   ;;  %s489_s18 = sshll.u32 %s622_s1, 4  ;;  %s623_s19 = smov [#allocation4]   ;;  %s490_s18 = int_to_ptr.vmem [resolvable:$true] %s489_s18 }
   0x7   :  { %s501_s20 = sshll.u32 %s623_s19, 4  ;;  %s566_s21 = scalar_lea.vmem %s490_s18, 128  ;;  %s502_s20 = int_to_ptr.vmem [resolvable:$true] %s501_s20 }
   0x8   :  { %p567_p0 = scmp.ne.s32.totalorder %s490_s18, %s566_s21  ;;  %p571_p1 = scmp.lt.s32.totalorder %s490_s18, %s490_s18 }
   0x9   :  { %p572_p2 = scmp.lt.s32.totalorder %s566_s21, %s566_s21 }
   0xb   :  { %p573_p3 = por %p572_p2, %p571_p1 }
   0xd   :  { %p574_p4 = pnand %p573_p3, %p567_p0 }
  0x81   :  { %v21_v4 = vpop.permute.xlu0 %20 }
  0x82   :  { %v655_v5 = vmul.f32 %v516_v3, %v21_v4 }
  0x84   :  { %v36_v6 = vand.u32 2147483647, %v655_v5  ;;  %v39_v7 = vand.u32 2139095040, %v655_v5  ;;  %vm38_vm14 = vcmp.lt.s32.totalorder %v655_v5, 0 }
  0x85   :  { %v26_v8 = vpop.permute.xlu0 %25 }
  0x86   :  { %v40_v9 = vshrl.u32 %v39_v7, 23  ;;  %v659_v10 = vmul.f32 %v516_v3, %v26_v8  ;;  %v43_v11 = vand.u32 8388607, %v36_v6  ;;  %vm713_vm15 = vcmp.le.f32.partialorder %v36_v6, 0.7853982 }
  0x88   :  { %v517_v12 = vadd.s32 4294967169, %v40_v9  ;;  %v142_v13 = vand.u32 2139095040, %v659_v10  ;;  %v44_v15 = vor.u32 8388608, %v43_v11  ;;  %v139_v17 = vand.u32 2147483647, %v659_v10 }
  0x8a   :  { %v46_v14 = vadd.s32 1, %v517_v12  ;;  %v143_v16 = vshrl.u32 %v142_v13, 23  ;;  %v665_v22 = vshll.u32 %v44_v15, 8  ;;  %v146_v26 = vand.u32 8388607, %v139_v17 }
  0x8c   :  { %vm47_vm0 = vcmp.gt.s32.totalorder %v46_v14, 0  ;;  %v521_v19 = vadd.s32 4294967169, %v143_v16  ;;  %v147_v56 = vor.u32 8388608, %v146_v26 }
  0x8d   :  { %v48_v18 = vsel %vm47_vm0, %v46_v14, 0  ;;  %vm141_vm0 = vcmp.lt.s32.totalorder %v659_v10, 0 }
  0x8e   :  { %v49_v20 = vshrl.u32 %v48_v18, 5  ;;  %v50_v21 = vand.u32 31, %v48_v18  ;;  %v149_v27 = vadd.s32 1, %v521_v19  ;;  %v187_v7 = vshll.u32 %v147_v56, 8 }
  0x90   :  { %v51_v23 = vsub.s32 32, %v50_v21  ;;  %v53_v25 = vshll.u32 %v615_v24, %v50_v21  ;;  %v56_v29 = vshll.u32 %v616_v28, %v50_v21  ;;  %v59_v31 = vshll.u32 %v617_v30, %v50_v21 }
  0x91   :  { %v62_v33 = vshll.u32 %v618_v32, %v50_v21  ;;  %v65_v35 = vshll.u32 %v619_v34, %v50_v21  ;;  %vm68_vm1 = vcmp.lt.s32.totalorder %v49_v20, 1  ;;  %vm70_vm2 = vcmp.lt.s32.totalorder %v49_v20, 3 }
  0x92   :  { %v54_v36 = vshrl.u32 %v616_v28, %v51_v23  ;;  %v57_v37 = vshrl.u32 %v617_v30, %v51_v23  ;;  %v60_v38 = vshrl.u32 %v618_v32, %v51_v23  ;;  %v52_v39 = vshrl.u32 %v615_v24, %v51_v23 }
  0x93   :  { %v63_v40 = vshrl.u32 %v619_v34, %v51_v23  ;;  %v66_v42 = vshrl.u32 %v620_v41, %v51_v23  ;;  %vm150_vm3 = vcmp.gt.s32.totalorder %v149_v27, 0  ;;  %vm71_vm4 = vcmp.lt.s32.totalorder %v49_v20, 4 }
  0x94   :  { %v55_v43 = vor.u32 %v54_v36, %v53_v25  ;;  %v58_v44 = vor.u32 %v57_v37, %v56_v29  ;;  %v61_v45 = vor.u32 %v60_v38, %v59_v31  ;;  %v151_v48 = vsel %vm150_vm3, %v149_v27, 0 }
  0x95   :  { %v64_v46 = vor.u32 %v63_v40, %v62_v33  ;;  %v67_v47 = vor.u32 %v66_v42, %v65_v35  ;;  %vm69_vm5 = vcmp.lt.s32.totalorder %v49_v20, 2  ;;  %v153_v59 = vand.u32 31, %v151_v48 }
  0x96   :  { %v72_v49 = vsel %vm68_vm1, %v52_v39, %v55_v43  ;;  %v73_v50 = vsel %vm71_vm4, %v61_v45, 2102212464  ;;  %v76_v51 = vsel %vm68_vm1, %v55_v43, %v58_v44  ;;  %v80_v52 = vsel %vm68_vm1, %v58_v44, %v61_v45 }
  0x97   :  { %v74_v53 = vsel %vm70_vm2, %v58_v44, %v73_v50  ;;  %v77_v54 = vsel %vm71_vm4, %v64_v46, 920167782  ;;  %v81_v55 = vsel %vm71_vm4, %v67_v47, 1326507024  ;;  %v152_v3 = vshrl.u32 %v151_v48, 5 }
  0x98   :  { %v78_v57 = vsel %vm70_vm2, %v61_v45, %v77_v54  ;;  %v82_v58 = vsel %vm70_vm2, %v64_v46, %v81_v55  ;;  %v75_v60 = vsel %vm69_vm5, %v72_v49, %v74_v53  ;;  %v154_v4 = vsub.s32 32, %v153_v59 }
  0x99   :  { %v79_v61 = vsel %vm69_vm5, %v76_v51, %v78_v57  ;;  %v83_v62 = vsel %vm69_vm5, %v80_v52, %v82_v58  ;;  %v91_v8 = vmul.u32 %v665_v22, %v75_v60  ;;  %v156_v9 = vshll.u32 %v615_v24, %v153_v59 }
  0x9a   :  { %v678_v63 = vmul.u32.u64.low %v665_v22, %v83_v62  ;;  %v679_v0 = vmul.u32.u64.high %v665_v22, %v83_v62, %v678_v63  ;;  %v682_v1 = vmul.u32.u64.low %v665_v22, %v79_v61  ;;  %v683_v2 = vmul.u32.u64.high %v665_v22, %v79_v61, %v682_v1 }
  0x9b   :  { %v159_v11 = vshll.u32 %v616_v28, %v153_v59  ;;  %v162_v12 = vshll.u32 %v617_v30, %v153_v59  ;;  %v157_v13 = vshrl.u32 %v616_v28, %v154_v4  ;;  %v160_v14 = vshrl.u32 %v617_v30, %v154_v4 }
  0x9c   :  { %v163_v15 = vshrl.u32 %v618_v32, %v154_v4  ;;  %v165_v16 = vshll.u32 %v618_v32, %v153_v59  ;;  %vm93_vm6 = vc.u32 %v679_v0, %v682_v1  ;;  %v94_v18 = vadd.s32 1, %v683_v2 }
  0x9d   :  { %v166_v19 = vshrl.u32 %v619_v34, %v154_v4  ;;  %v168_v20 = vshll.u32 %v619_v34, %v153_v59  ;;  %v158_v21 = vor.u32 %v157_v13, %v156_v9  ;;  %v161_v23 = vor.u32 %v160_v14, %v159_v11 }
  0x9e   :  { %v164_v25 = vor.u32 %v163_v15, %v162_v12  ;;  %v169_v26 = vshrl.u32 %v620_v41, %v154_v4  ;;  %v95_v22 = vsel %vm93_vm6, %v94_v18, %v683_v2  ;;  %vm171_vm7 = vcmp.lt.s32.totalorder %v152_v3, 1 }
  0x9f   :  { %v167_v27 = vor.u32 %v166_v19, %v165_v16  ;;  %vm174_vm8 = vcmp.lt.s32.totalorder %v152_v3, 4  ;;  %v96_v28 = vadd.s32 %v95_v22, %v91_v8  ;;  %vm173_vm9 = vcmp.lt.s32.totalorder %v152_v3, 3 }
  0xa0   :  { %v170_v29 = vor.u32 %v169_v26, %v168_v20  ;;  %v176_v30 = vsel %vm174_vm8, %v164_v25, 2102212464  ;;  %v155_v31 = vshrl.u32 %v615_v24, %v154_v4  ;;  %v179_v32 = vsel %vm171_vm7, %v158_v21, %v161_v23 }
  0xa1   :  { %v180_v33 = vsel %vm174_vm8, %v167_v27, 920167782  ;;  %v183_v35 = vsel %vm171_vm7, %v161_v23, %v164_v25  ;;  %v97_v36 = vadd.s32 536870912, %v96_v28  ;;  %vm172_vm10 = vcmp.lt.s32.totalorder %v152_v3, 2 }
  0xa2   :  { %v181_v34 = vsel %vm173_vm9, %v164_v25, %v180_v33  ;;  %v184_v37 = vsel %vm174_vm8, %v170_v29, 1326507024  ;;  %v175_v38 = vsel %vm171_vm7, %v155_v31, %v158_v21  ;;  %v177_v39 = vsel %vm173_vm9, %v161_v23, %v176_v30 }
  0xa3   :  { %v182_v40 = vsel %vm172_vm10, %v179_v32, %v181_v34  ;;  %v185_v41 = vsel %vm173_vm9, %v167_v27, %v184_v37  ;;  %v693_v42 = vshrl.u32 %v97_v36, 30  ;;  %v178_v48 = vsel %vm172_vm10, %v175_v38, %v177_v39 }
  0xa4   :  { %v186_v43 = vsel %vm172_vm10, %v183_v35, %v185_v41  ;;  %v695_v44 = vmul.u32.u64.low %v187_v7, %v182_v40  ;;  %v696_v45 = vmul.u32.u64.high %v187_v7, %v182_v40, %v695_v44  ;;  %v194_v51 = vmul.u32 %v187_v7, %v178_v48 }
  0xa5   :  { %v698_v46 = vmul.u32.u64.low %v187_v7, %v186_v43  ;;  %v699_v47 = vmul.u32.u64.high %v187_v7, %v186_v43, %v698_v46  ;;  %v99_v24 = vshll.u32 %v693_v42, 30  ;;  %v92_v63 = vadd.s32 %v682_v1, %v679_v0 }
  0xa6   :  { %v197_v50 = vadd.s32 1, %v696_v45  ;;  %v122_v34 = vsub.s32 4, %v693_v42  ;;  %vm140_vm1 = vcmp.le.f32.partialorder %v139_v17, 0.7853982 }
  0xa7   :  { %v100_v49 = vsub.s32 %v96_v28, %v99_v24  ;;  %vm196_vm11 = vc.u32 %v699_v47, %v695_v44  ;;  %v195_v23 = vadd.s32 %v695_v44, %v699_v47 }
  0xa8   :  { %v198_v53 = vsel %vm196_vm11, %v197_v50, %v696_v45  ;;  %v123_v6 = vsel %vm38_vm14, %v122_v34, %v693_v42 }
  0xa9   :  { %v102_v52 = vsub.s32 0, %v100_v49  ;;  %v199_v54 = vadd.s32 %v198_v53, %v194_v51  ;;  %v125_v43 = vsel %vm713_vm15, 0, %v123_v6 }
  0xaa   :  { %v335_v47 = vadd.s32 3, %v125_v43  ;;  %v129_v42 = vand.u32 3, %v125_v43 }
  0xab   :  { %v518_v55 = vmin.u32 %v102_v52, %v100_v49  ;;  %v200_v56 = vadd.s32 536870912, %v199_v54 }
  0xac   :  { %v336_v51 = vand.u32 3, %v335_v47  ;;  %vm131_vm2 = vcmp.eq.s32.totalorder %v129_v42, 0  ;;  %vm134_vm3 = vcmp.eq.s32.totalorder %v129_v42, 2  ;;  %vm130_vm4 = vcmp.lt.s32.totalorder %v129_v42, 2 }
  0xad   :  { %v104_v57 = vclz %v518_v55  ;;  %v201_v58 = vshrl.u32 %v200_v56, 30 }
  0xae   :  { %vm338_vm5 = vcmp.eq.s32.totalorder %v336_v51, 0  ;;  %vm341_vm8 = vcmp.eq.s32.totalorder %v336_v51, 2 }
  0xaf   :  { %v519_v59 = vadd.s32 4294967294, %v104_v57  ;;  %v202_v60 = vshll.u32 %v201_v58, 30  ;;  %v225_v38 = vsub.s32 4, %v201_v58 }
  0xb1   :  { %vm520_vm12 = vcmp.lt.s32.totalorder %v519_v59, 0  ;;  %v203_v62 = vsub.s32 %v199_v54, %v202_v60  ;;  %v226_v41 = vsel %vm141_vm0, %v225_v38, %v201_v58 }
  0xb2   :  { %v107_v61 = vsel %vm520_vm12, 0, %v519_v59  ;;  %v228_v45 = vsel %vm140_vm1, 0, %v226_v41 }
  0xb3   :  { %v108_v2 = vsub.s32 32, %v107_v61  ;;  %v112_v3 = vsub.s32 4294967266, %v107_v61  ;;  %v205_v4 = vsub.s32 0, %v203_v62  ;;  %v109_v7 = vshll.u32 %v100_v49, %v107_v61 }
  0xb4   :  { %v439_v48 = vadd.s32 3, %v228_v45  ;;  %v232_v52 = vand.u32 3, %v228_v45 }
  0xb5   :  { %v110_v8 = vshrl.u32 %v92_v63, %v108_v2  ;;  %v113_v9 = vadd.s32 127, %v112_v3  ;;  %v522_v11 = vmin.u32 %v205_v4, %v203_v62 }
  0xb6   :  { %v440_v53 = vand.u32 3, %v439_v48  ;;  %vm233_vm6 = vcmp.lt.s32.totalorder %v232_v52, 2  ;;  %vm234_vm7 = vcmp.eq.s32.totalorder %v232_v52, 0  ;;  %vm237_vm9 = vcmp.eq.s32.totalorder %v232_v52, 2 }
  0xb7   :  { %v111_v12 = vor.u32 %v110_v8, %v109_v7  ;;  %v114_v13 = vshll.u32 %v113_v9, 23  ;;  %v207_v14 = vclz %v522_v11 }
  0xb8   :  { %vm441_vm10 = vcmp.lt.s32.totalorder %v440_v53, 2  ;;  %vm445_vm11 = vcmp.eq.s32.totalorder %v440_v53, 2  ;;  %vm442_vm12 = vcmp.eq.s32.totalorder %v440_v53, 0 }
  0xb9   :  { %v115_v15 = vor.u32 4788187, %v114_v13  ;;  %v523_v16 = vadd.s32 4294967294, %v207_v14  ;;  %v118_v19 = vcvt.s32.f32 %v111_v12 }
  0xbb   :  { %v116_v18 = vand.u32 2147483647, %v115_v15  ;;  %vm524_vm13 = vcmp.lt.s32.totalorder %v523_v16, 0 }
  0xbc   :  { %v210_v21 = vsel %vm524_vm13, 0, %v523_v16  ;;  %vm128_vm13 = vweird.f32 %v655_v5 }
  0xbd   :  { %v119_v20 = vmul.f32 %v118_v19, %v116_v18  ;;  %v211_v0 = vsub.s32 32, %v210_v21  ;;  %v215_v1 = vsub.s32 4294967266, %v210_v21  ;;  %v212_v26 = vshll.u32 %v203_v62, %v210_v21 }
  0xbf   :  { %v120_v25 = vxor.u32 2147483648, %v119_v20  ;;  %v213_v22 = vshrl.u32 %v195_v23, %v211_v0  ;;  %v216_v27 = vadd.s32 127, %v215_v1 }
  0xc1   :  { %v121_v28 = vsel %vm38_vm14, %v120_v25, %v119_v20  ;;  %v214_v29 = vor.u32 %v213_v22, %v212_v26  ;;  %v217_v30 = vshll.u32 %v216_v27, 23  ;;  %vm231_vm14 = vweird.f32 %v659_v10 }
  0xc2   :  { %v124_v32 = vsel %vm713_vm15, %v655_v5, %v121_v28  ;;  %vm337_vm15 = vcmp.lt.s32.totalorder %v336_v51, 2 }
  0xc3   :  { %v218_v33 = vor.u32 4788187, %v217_v30  ;;  %v221_v36 = vcvt.s32.f32 %v214_v29  ;;  %558 = vcosq.f32 %v124_v32 }
  0xc4   :  { %560 = vsinq.f32 %v124_v32 }
  0xc5   :  { %v219_v35 = vand.u32 2147483647, %v218_v33 }
  0xc7   :  { %v222_v37 = vmul.f32 %v221_v36, %v219_v35 }
  0xc9   :  { %v223_v39 = vxor.u32 2147483648, %v222_v37 }
  0xcb   :  { %v224_v40 = vsel %vm141_vm0, %v223_v39, %v222_v37  ;;  %vm455_vm0 = vcmask 261120  }
  0xcc   :  { %v227_v44 = vsel %vm140_vm1, %v659_v10, %v224_v40  ;;  %vm466_vm1 = vcmask 519168  }
  0xcd   :  { %562 = vcosq.f32 %v227_v44  ;;  %v559_v46 = vpop.eup %558 }
  0xce   :  { %564 = vsinq.f32 %v227_v44  ;;  %v561_v24 = vpop.eup %560  ;;  %v135_v50 = vxor.u32 2147483648, %v559_v46 }
  0xcf   :  { %v132_v49 = vxor.u32 2147483648, %v561_v24 }
  0xd0   :  { %v136_v55 = vsel %vm134_vm3, %v135_v50, %v561_v24  ;;  %v343_v2 = vsel %vm341_vm8, %v135_v50, %v561_v24 }
  0xd1   :  { %v133_v54 = vsel %vm131_vm2, %v559_v46, %v132_v49  ;;  %v340_v63 = vsel %vm338_vm5, %v559_v46, %v132_v49 }
  0xd2   :  { %v137_v59 = vsel %vm130_vm4, %v133_v54, %v136_v55  ;;  %v344_v11 = vsel %vm337_vm15, %v340_v63, %v343_v2 }
  0xd3   :  { %v138_v8 = vsel %vm128_vm13, nan, %v137_v59  ;;  %v345_v14 = vsel %vm128_vm13, nan, %v344_v11 }
  0xd7   :  { %v563_v17 = vpop.eup %562 }
  0xd8   :  { %v565_v56 = vpop.eup %564  ;;  %v238_v57 = vxor.u32 2147483648, %v563_v17 }
  0xd9   :  { %v235_v58 = vxor.u32 2147483648, %v565_v56 }
  0xda   :  { %v239_v60 = vsel %vm237_vm9, %v238_v57, %v565_v56  ;;  %v447_v61 = vsel %vm445_vm11, %v238_v57, %v565_v56 }
  0xdb   :  { %v236_v62 = vsel %vm234_vm7, %v563_v17, %v235_v58  ;;  %v444_v3 = vsel %vm442_vm12, %v563_v17, %v235_v58 }
  0xdc   :  { %v240_v4 = vsel %vm233_vm6, %v236_v62, %v239_v60  ;;  %v448_v7 = vsel %vm441_vm10, %v444_v3, %v447_v61 }
  0xdd   :  { %v241_v9 = vsel %vm231_vm14, nan, %v240_v4  ;;  %v449_v13 = vsel %vm231_vm14, nan, %v448_v7 }
  0xde   :  { %v450_v12 = vpack.c.bf16 %v241_v9, %v138_v8  ;;  %v451_v15 = vpack.c.bf16 %v449_v13, %v345_v14 }
  0xe0   :  { %453 = vrot.lane.b32.xlu1 %v450_v12, %s621_s0 }
  0xe4   :  { %470 = vrot.lane.b32.xlu1 %v451_v15, %s621_s0 }
 0x152   :  { %v454_v5 = vpop.permute.xlu1 %453 }
 0x153   :  { %v458_v10 = vsel %vm455_vm0, %v450_v12, %v454_v5 }
 0x154   :  { %v533_v16 = vcombine.low %v458_v10, %v458_v10  ;;  %v534_v18 = vcombine.high %v458_v10, %v458_v10 }
 0x156   :  { %467 = vst.msk [vmem:[#allocation2] sm:$0xf] %vm466_vm1, %v533_v16  ;;  %468 = vst.msk [vmem:[#allocation2 + $0x4] sm:$0xf] %vm466_vm1, %v534_v18  ;;  %v471_v19 = vpop.permute.xlu1 %470 }
 0x157   :  { %v474_v20 = vsel %vm455_vm0, %v451_v15, %v471_v19 }
 0x158   :  { %577 = shalt.err (!%p574_p4)
}
 0x159   :  { %s578_s24 = scalar_lea.hbm %s763_s2, 128 }
 0x15a   :  { %p579_p5 = scmp.ne.s32.totalorder %s763_s2, %s578_s24  ;;  %p582_p6 = scmp.lt.u32.totalorder %s578_s24, %s763_s2 }
 0x15c   :  { %p584_p7 = pnand %p582_p6, %p579_p5 }
 0x15e   :  { %587 = shalt.err (!%p584_p7)
}
 0x15f   :  { %s624_s29 = smov 64   ;;  %s625_s30 = smov 4   ;;  %v535_v21 = vcombine.low %v474_v20, %v474_v20  ;;  %v536_v23 = vcombine.high %v474_v20, %v474_v20 }
 0x160   :  { %495 = dma.vmem_to_hbm [thread:$0]  %s490_s18, 128, %s763_s2, [#allocation3], %s624_s29, %s624_s29, %s625_s30  }
 0x161   :  { %482 = vst.msk [vmem:[#allocation4] sm:$0xf] %vm466_vm1, %v535_v21  ;;  %483 = vst.msk [vmem:[#allocation4 + $0x4] sm:$0xf] %vm466_vm1, %v536_v23  ;;  %s588_s6 = scalar_lea.vmem %s502_s20, 128  ;;  %p593_p9 = scmp.lt.s32.totalorder %s502_s20, %s502_s20 }
 0x162   :  { %p589_p8 = scmp.ne.s32.totalorder %s502_s20, %s588_s6  ;;  %p594_p10 = scmp.lt.s32.totalorder %s588_s6, %s588_s6 }
 0x164   :  { %p595_p11 = por %p594_p10, %p593_p9 }
 0x166   :  { %p596_p12 = pnand %p595_p11, %p589_p8 }
 0x168   :  { %599 = shalt.err (!%p596_p12)
}
 0x169   :  { %s600_s9 = scalar_lea.hbm %s764_s3, 128 }
 0x16a   :  { %p601_p13 = scmp.ne.s32.totalorder %s764_s3, %s600_s9  ;;  %p604_p0 = scmp.lt.u32.totalorder %s600_s9, %s764_s3 }
 0x16c   :  { %p606_p1 = pnand %p604_p0, %p601_p13 }
 0x16e   :  { %609 = shalt.err (!%p606_p1)
}
 0x16f   :  { %507 = dma.vmem_to_hbm [thread:$0]  %s502_s20, 128, %s764_s3, [#allocation5], %s624_s29, %s624_s29, %s625_s30  }
 0x170   :  { %610 = dma.done.wait [#allocation3], 128  }
 0x171   :  { %611 = vsyncadd [#allocation3], 4294967168 }
 0x172   :  { %612 = dma.done.wait [#allocation5], 128  }
 0x173   :  { %613 = vsyncadd [#allocation5], 4294967168 }
 0x174   :  { %514 = vsyncpa [#allocation3], 1 }
 0x175   :  { %515 = vsyncpa [#allocation5], 1 }

</bundles_post_ra>
